<compile_context>
chip_gen: v5e
topology: v5e:2x2
jax: 0.10.0
libtpu: 0.0.40
codegen_flags: <defaults>
</compile_context>

<pallas_src>
import functools

import jax
import jax.numpy as jnp
from jax.experimental import pallas as pl
from jax.experimental.pallas import tpu as pltpu

HIDDEN = 128  # fixed by the module definition (nn.Linear(input_dim, 128))


def expert_kernel(x_ref, w1_ref, b1_ref, w2_ref, b2_ref, o_ref, *,
                  compute_dtype):
    # Cast the activation tile to the MXU input dtype in VMEM (avoids a
    # separate wrapper-side cast pass over the batch-scaled tensor).
    x = x_ref[...].astype(compute_dtype)
    # First linear (MXU, bf16 in / f32 acc) + bias + ReLU in f32 on the VPU.
    h = jnp.dot(x, w1_ref[...], preferred_element_type=jnp.float32)
    h = jnp.maximum(h + b1_ref[...], 0.0)
    # Second linear: activations downcast to the weight dtype before the MXU;
    # accumulation stays f32.
    y = jnp.dot(h.astype(w2_ref.dtype), w2_ref[...],
                preferred_element_type=jnp.float32)
    o_ref[...] = (y + b2_ref[...]).astype(o_ref.dtype)


def _round_up(x, m):
    return ((x + m - 1) // m) * m


@functools.partial(jax.jit, static_argnames=("batch_tile", "compute_dtype"))
def expert_forward(x, w1, b1, w2, b2, *, batch_tile=256,
                   compute_dtype=jnp.bfloat16):
    """x: (B, D_in) f32, w1: (D_in, 128), b1: (1,128), w2: (128, D_out),
    b2: (1, D_out)  ->  (B, D_out) f32."""
    B, D_in = x.shape
    D_out = w2.shape[1]
    out_dtype = x.dtype
    x_bytes = jnp.dtype(x.dtype).itemsize
    w_bytes = jnp.dtype(compute_dtype).itemsize
    o_bytes = jnp.dtype(out_dtype).itemsize

    # ---- layout prep (wrapper-side, traced once under jit) -----------------
    # Clamp the batch tile so small batches don't compute on padding; keep it
    # a multiple of 8 (sublane).
    bt = min(batch_tile, _round_up(B, 8))
    B_pad = _round_up(B, bt)
    # Lane-dense output: pad D_out up to a multiple of 128 (unmasked stores).
    D_out_p = _round_up(D_out, 128)

    xp = x if B_pad == B else jnp.pad(x, ((0, B_pad - B), (0, 0)))
    w1c = w1.astype(compute_dtype)
    w2p = w2 if D_out_p == D_out else jnp.pad(w2, ((0, 0), (0, D_out_p - D_out)))
    w2c = w2p.astype(compute_dtype)
    b1f = b1.astype(jnp.float32)
    b2p = b2 if D_out_p == D_out else jnp.pad(b2, ((0, 0), (0, D_out_p - D_out)))
    b2f = b2p.astype(jnp.float32)

    grid = (B_pad // bt,)

    # Double-buffered per-step VMEM footprint, with headroom; capped well
    # below v7x's 64 MiB physical VMEM.
    per_step = (bt * D_in * x_bytes                   # x tile (f32)
                + D_in * HIDDEN * w_bytes             # w1 (bf16)
                + HIDDEN * D_out_p * w_bytes          # w2 (bf16)
                + HIDDEN * 4 + D_out_p * 4            # biases (f32)
                + bt * D_out_p * o_bytes)             # out tile
    vmem_limit = int(min(max(2 * per_step + (4 << 20), 16 << 20), 48 << 20))

    cost = pl.CostEstimate(
        flops=2 * B_pad * D_in * HIDDEN + 2 * B_pad * HIDDEN * D_out_p,
        transcendentals=0,
        bytes_accessed=(B_pad * D_in * x_bytes
                        + D_in * HIDDEN * w_bytes
                        + HIDDEN * D_out_p * w_bytes
                        + HIDDEN * 4 + D_out_p * 4
                        + B_pad * D_out_p * o_bytes),
    )

    kern = functools.partial(expert_kernel, compute_dtype=compute_dtype)

    out = pl.pallas_call(
        kern,
        out_shape=jax.ShapeDtypeStruct((B_pad, D_out_p), out_dtype),
        grid_spec=pltpu.PrefetchScalarGridSpec(
            num_scalar_prefetch=0,
            grid=grid,
            in_specs=[
                # x tiled over batch rows; weights/biases resident (constant
                # index_map -> fetched once, not re-DMA'd per step).
                pl.BlockSpec((bt, D_in), lambda i: (i, 0)),
                pl.BlockSpec((D_in, HIDDEN), lambda i: (0, 0)),
                pl.BlockSpec((1, HIDDEN), lambda i: (0, 0)),
                pl.BlockSpec((HIDDEN, D_out_p), lambda i: (0, 0)),
                pl.BlockSpec((1, D_out_p), lambda i: (0, 0)),
            ],
            out_specs=pl.BlockSpec((bt, D_out_p), lambda i: (i, 0)),
        ),
        compiler_params=pltpu.CompilerParams(
            dimension_semantics=("parallel",),
            vmem_limit_bytes=vmem_limit),
        cost_estimate=cost,
    )(xp, w1c, b1f, w2c, b2f)

    return out[:B, :D_out]


def reference_forward(x, w1, b1, w2, b2):
    h = jnp.maximum(x @ w1 + b1, 0.0)
    return h @ w2 + b2


if __name__ == "__main__":
    # Small shapes consistent with Expert(input_dim=32, output_dim=16).
    batch, input_dim, output_dim = 8, 32, 16

    key = jax.random.PRNGKey(0)
    kx, k1, k2, k3, k4 = jax.random.split(key, 5)

    x = jax.random.normal(kx, (batch, input_dim), dtype=jnp.float32)
    w1 = jax.random.normal(k1, (input_dim, HIDDEN), dtype=jnp.float32) * 0.05
    b1 = jax.random.normal(k2, (1, HIDDEN), dtype=jnp.float32) * 0.05
    w2 = jax.random.normal(k3, (HIDDEN, output_dim), dtype=jnp.float32) * 0.05
    b2 = jax.random.normal(k4, (1, output_dim), dtype=jnp.float32) * 0.05

    out = expert_forward(x, w1, b1, w2, b2)
    out = jax.block_until_ready(out)

    ref = reference_forward(x, w1, b1, w2, b2)
    assert out.shape == (batch, output_dim)
    # bf16 MXU inputs with f32 accumulation -> relaxed tolerance vs f32 ref.
    assert jnp.allclose(out, ref, atol=1e-2, rtol=1e-2), "mismatch vs reference"

    print("KERNEL_OK")
</pallas_src>

<mosaic_0001>
module attributes {stable_mosaic.version = 11 : i64} {
  func.func @expert_kernel(%arg0: i32, %arg1: memref<8x32xf32, #tpu.memory_space<vmem>>, %arg2: memref<32x128xbf16, #tpu.memory_space<vmem>>, %arg3: memref<1x128xf32, #tpu.memory_space<vmem>>, %arg4: memref<128x128xbf16, #tpu.memory_space<vmem>>, %arg5: memref<1x128xf32, #tpu.memory_space<vmem>>, %arg6: memref<8x128xf32, #tpu.memory_space<vmem>>) attributes {dimension_semantics = [#tpu.dimension_semantics<parallel>], iteration_bounds = array<i64: 1>, scalar_prefetch = 0 : i64, scratch_operands = 0 : i64, tpu.core_type = #tpu.core_type<tc>, window_params = [{transform_indices = @transform_0, window_bounds = array<i64: 8, 32>}, {pipeline_mode = #tpu.pipeline_mode<synchronous>, transform_indices = @transform_1, window_bounds = array<i64: 32, 128>}, {pipeline_mode = #tpu.pipeline_mode<synchronous>, transform_indices = @transform_2, window_bounds = array<i64: 1, 128>}, {pipeline_mode = #tpu.pipeline_mode<synchronous>, transform_indices = @transform_3, window_bounds = array<i64: 128, 128>}, {pipeline_mode = #tpu.pipeline_mode<synchronous>, transform_indices = @transform_4, window_bounds = array<i64: 1, 128>}, {transform_indices = @transform_5, window_bounds = array<i64: 8, 128>}]} {
    %c0 = arith.constant 0 : index
    %c0_0 = arith.constant 0 : index
    %0 = vector.load %arg1[%c0, %c0_0] : memref<8x32xf32, #tpu.memory_space<vmem>>, vector<8x32xf32>
    %1 = arith.truncf %0 : vector<8x32xf32> to vector<8x32xbf16>
    %c0_1 = arith.constant 0 : index
    %c0_2 = arith.constant 0 : index
    %2 = vector.load %arg2[%c0_1, %c0_2] : memref<32x128xbf16, #tpu.memory_space<vmem>>, vector<32x128xbf16>
    %cst = arith.constant dense<0.000000e+00> : vector<8x128xf32>
    %3 = tpu.matmul %1, %2, %cst {dimension_numbers = #tpu.dot_dimension_numbers<[1], [0], [0], [1], [0, 0, 1, 1], [], []>} : vector<8x32xbf16>, vector<32x128xbf16>, vector<8x128xf32> -> vector<8x128xf32>
    %c0_3 = arith.constant 0 : index
    %c0_4 = arith.constant 0 : index
    %4 = vector.load %arg3[%c0_3, %c0_4] : memref<1x128xf32, #tpu.memory_space<vmem>>, vector<1x128xf32>
    %5 = vector.broadcast %4 : vector<1x128xf32> to vector<8x128xf32>
    %6 = arith.addf %3, %5 : vector<8x128xf32>
    %cst_5 = arith.constant 0.000000e+00 : f32
    %7 = vector.broadcast %cst_5 : f32 to vector<8x128xf32>
    %8 = arith.maximumf %6, %7 : vector<8x128xf32>
    %9 = arith.truncf %8 : vector<8x128xf32> to vector<8x128xbf16>
    %c0_6 = arith.constant 0 : index
    %c0_7 = arith.constant 0 : index
    %10 = vector.load %arg4[%c0_6, %c0_7] : memref<128x128xbf16, #tpu.memory_space<vmem>>, vector<128x128xbf16>
    %cst_8 = arith.constant dense<0.000000e+00> : vector<8x128xf32>
    %11 = tpu.matmul %9, %10, %cst_8 {dimension_numbers = #tpu.dot_dimension_numbers<[1], [0], [0], [1], [0, 0, 1, 1], [], []>} : vector<8x128xbf16>, vector<128x128xbf16>, vector<8x128xf32> -> vector<8x128xf32>
    %c0_9 = arith.constant 0 : index
    %c0_10 = arith.constant 0 : index
    %12 = vector.load %arg5[%c0_9, %c0_10] : memref<1x128xf32, #tpu.memory_space<vmem>>, vector<1x128xf32>
    %13 = vector.broadcast %12 : vector<1x128xf32> to vector<8x128xf32>
    %14 = arith.addf %11, %13 : vector<8x128xf32>
    %c0_11 = arith.constant 0 : index
    %c0_12 = arith.constant 0 : index
    %15 = vector.load %arg6[%c0_11, %c0_12] : memref<8x128xf32, #tpu.memory_space<vmem>>, vector<8x128xf32>
    tpu.vector_store %arg6[%c0_11, %c0_12], %14 {strides = array<i32>} : memref<8x128xf32, #tpu.memory_space<vmem>>, vector<8x128xf32>,
    return
  }
  func.func @transform_0(%arg0: i32) -> (i32, i32) {
    %c0_i32 = arith.constant 0 : i32
    %c0_i32_0 = arith.constant 0 : i32
    return %arg0, %c0_i32 : i32, i32
  }
  func.func @transform_1(%arg0: i32) -> (i32, i32) {
    %c0_i32 = arith.constant 0 : i32
    %c0_i32_0 = arith.constant 0 : i32
    %c0_i32_1 = arith.constant 0 : i32
    return %c0_i32, %c0_i32_0 : i32, i32
  }
  func.func @transform_2(%arg0: i32) -> (i32, i32) {
    %c0_i32 = arith.constant 0 : i32
    %c0_i32_0 = arith.constant 0 : i32
    %c0_i32_1 = arith.constant 0 : i32
    return %c0_i32, %c0_i32_0 : i32, i32
  }
  func.func @transform_3(%arg0: i32) -> (i32, i32) {
    %c0_i32 = arith.constant 0 : i32
    %c0_i32_0 = arith.constant 0 : i32
    %c0_i32_1 = arith.constant 0 : i32
    return %c0_i32, %c0_i32_0 : i32, i32
  }
  func.func @transform_4(%arg0: i32) -> (i32, i32) {
    %c0_i32 = arith.constant 0 : i32
    %c0_i32_0 = arith.constant 0 : i32
    %c0_i32_1 = arith.constant 0 : i32
    return %c0_i32, %c0_i32_0 : i32, i32
  }
  func.func @transform_5(%arg0: i32) -> (i32, i32) {
    %c0_i32 = arith.constant 0 : i32
    %c0_i32_0 = arith.constant 0 : i32
    return %arg0, %c0_i32 : i32, i32
  }
}

</mosaic_0001>

<bundles_post_ra>
// kernel: expert_forward.1
= control target key start
LH: loop header
LB: loop body
LE: loop exit
PB: predicated region body
PF: predicated region fallthrough
CT: control target
= control target key end

     0   :  { %s314_s0 = inlined_call_operand.vmem [shape: f32[8,32], index: 0, kind: input, shape index: {}]   ;;  %s315_s1 = inlined_call_operand.vmem [shape: bf16[32,128], index: 1, kind: input, shape index: {}]   ;;  %s316_s2 = inlined_call_operand.vmem [shape: f32[1,128], index: 2, kind: input, shape index: {}]   ;;  %s317_s3 = inlined_call_operand.vmem [shape: bf16[128,128], index: 3, kind: input, shape index: {}]   ;;  %s318_s4 = inlined_call_operand.vmem [shape: f32[1,128], index: 4, kind: input, shape index: {}]   ;;  %s319_s5 = inlined_call_operand.hbm [shape: f32[8,128], index: 5, kind: output, shape index: {}]  }
   0x1   :  { %v203_v0 = vld [vmem:[%s315_s1 + $0x8] sm:$0xff]  ;;  %v211_v1 = vld [vmem:[%s317_s3 + $0x38] sm:$0xff]  ;;  %v202_v2 = vld [vmem:[%s315_s1] sm:$0xff] }
   0x2   :  { %54 = vmatpush.bf16.msra.mxu0 %v203_v0  ;;  %v22_v3 = vld [vmem:[%s314_s0] sm:$0xff]  ;;  %131 = vmatpush.bf16.msra.mxu1 %v211_v1  ;;  %v210_v4 = vld [vmem:[%s317_s3 + $0x30] sm:$0xff] }
   0x3   :  { %10 = vsyncpa [#allocation3], 0  ;;  %v23_v5 = vpack.c.bf16 %v22_v3, %v22_v3  ;;  %vm44_vm0 = vcmask 261120   ;;  %v209_v6 = vld [vmem:[%s317_s3 + $0x28] sm:$0xff]  ;;  %v208_v7 = vld [vmem:[%s317_s3 + $0x20] sm:$0xff]  ;;  %s241_s17 = smov [#allocation2]  }
   0x4   :  { %v207_v8 = vld [vmem:[%s317_s3 + $0x18] sm:$0xff]  ;;  %v206_v9 = vld [vmem:[%s317_s3 + $0x10] sm:$0xff]  ;;  %v205_v10 = vld [vmem:[%s317_s3 + $0x8] sm:$0xff]  ;;  %s150_s18 = sshll.u32 %s241_s17, 4  ;;  %s151_s18 = int_to_ptr.vmem [resolvable:$true] %s150_s18 }
   0x5   :  { %v204_v11 = vld [vmem:[%s317_s3] sm:$0xff]  ;;  %s152_s3 = sshll.u32 %s319_s5, 4  ;;  %s153_s3 = int_to_ptr.hbm [resolvable:$true] %s152_s3 }
   0x6   :  { %55 = vmatpush.bf16.msra.mxu0 %v202_v2  ;;  %132 = vmatpush.bf16.msra.mxu1 %v210_v4  ;;  %v213_v12 = vld [vmem:[%s316_s2] ss:$0 sm:$0xff] }
   0x7   :  { %v214_v18 = vld [vmem:[%s318_s4] ss:$0 sm:$0xff] }
   0x9   :  { %169 = vmatmul.msk.bf16.vlgmr.msra.gmra.mxu0 %vm44_vm0, %v23_v5 }
   0xa   :  { %133 = vmatpush.bf16.msra.mxu1 %v209_v6 }
   0xe   :  { %134 = vmatpush.bf16.msra.mxu1 %v208_v7 }
  0x12   :  { %135 = vmatpush.bf16.msra.mxu1 %v207_v8 }
  0x16   :  { %136 = vmatpush.bf16.msra.mxu1 %v206_v9 }
  0x1a   :  { %137 = vmatpush.bf16.msra.mxu1 %v205_v10 }
  0x1e   :  { %138 = vmatpush.bf16.msra.mxu1 %v204_v11 }
  0x86   :  { %v57_v13 = vpop.f32.mrf.mxu0 }
  0x87   :  { %v58_v14 = vadd.f32 %v213_v12, %v57_v13 }
  0x89   :  { %v61_v15 = vmax.f32 %v58_v14, 0.0 }
  0x8b   :  { %v62_v16 = vpack.c.bf16 %v61_v15, %v61_v15 }
  0x8d   :  { %139 = vmatmul.bf16.vlgmr.msra.gmra.mxu1 %v62_v16 }
  0x8e   :  { %v59_v17 = vpop.f32.mrf.mxu0 }
 0x10a   :  { %v140_v19 = vpop.f32.mrf.mxu1 }
 0x10b   :  { %v141_v20 = vadd.f32 %v214_v18, %v140_v19 }
 0x10d   :  { %144 = vst [vmem:[#allocation2] sm:$0xff] %v141_v20 }
 0x10e   :  { %155 = dma.vmem_to_hbm [thread:$0]  %s151_s18, 128, %s153_s3, [#allocation3]  }
 0x112   :  { %v142_v21 = vpop.f32.mrf.mxu1 }
 0x113   :  { %239 = dma.done.wait [#allocation3], 128  }
 0x114   :  { %240 = vsyncadd [#allocation3], 4294967168 }
 0x115   :  { %160 = vsyncpa [#allocation3], 1 }

</bundles_post_ra>
